<compile_context>
chip_gen: v5e
topology: v5e:2x2
jax: 0.10.0
libtpu: 0.0.40
codegen_flags: <defaults>
</compile_context>

<pallas_src>
import jax
import jax.numpy as jnp
from jax.experimental import pallas as pl
from jax.experimental.pallas import tpu as pltpu


def _round_up(x, m):
    return -(-x // m) * m


def _unembed_kernel(x_ref, o_ref):
    # x_ref: (tile_l, C) slab of tokens from one image; o_ref: (C, tile_l).
    # The transpose runs on the XLU (idle otherwise); the store is lane-dense
    # along tile_l (multiple of 128).
    o_ref[...] = x_ref[...].T


def _tile_vmem_bytes(tile_l, C, itemsize):
    """Real (padded, double-buffered) VMEM footprint of one grid step's tiles."""
    in_tile = tile_l * _round_up(C, 128) * itemsize     # (tile_l, C): lane dim pads to 128
    out_tile = _round_up(C, 8) * tile_l * itemsize      # (C, tile_l): sublane dim pads to 8
    return 2 * (in_tile + out_tile)                     # x2 double buffering on both sides


def _pick_tile_l(L_pad, B, C, itemsize, budget_bytes=8 << 20):
    """Largest multiple-of-128 divisor of L_pad whose padded, double-buffered tiles
    fit `budget_bytes`, while keeping >= 2 parallel grid steps when possible
    (so both v7x TensorCores get work even at B == 1)."""
    per_row = 2 * (_round_up(C, 128) + _round_up(C, 8)) * itemsize
    max_t_vmem = max(128, (budget_bytes // per_row) // 128 * 128)
    max_t_steps = L_pad if B >= 2 else max(128, (L_pad // 2) // 128 * 128)
    cap = min(L_pad, max_t_vmem, max_t_steps)
    best = 128
    t = 128
    while t <= cap:
        if L_pad % t == 0:
            best = t
        t += 128
    return best


def patch_unembed_forward(x, x_size, *, tile_l=None):
    """PatchUnEmbed.forward.

    x:      (B, L, C) with L == H*W and C == embed_dim
    x_size: (H, W)
    returns (B, C, H, W)
    """
    B, L, C = x.shape
    H, W = x_size
    assert L == H * W, "x_size inconsistent with token count"
    itemsize = jnp.dtype(x.dtype).itemsize

    # Ragged L: pad the token axis up to a multiple of 512 so a lane-aligned,
    # reasonably wide tile always exists; run the kernel on the padded tensor
    # and slice the result afterwards.
    if L % 128 != 0:
        L_pad = _round_up(L, 512)
        x_k = jnp.pad(x, ((0, 0), (0, L_pad - L), (0, 0)))
    else:
        L_pad = L
        x_k = x

    if tile_l is None:
        tile_l = _pick_tile_l(L_pad, B, C, itemsize)
    assert L_pad % tile_l == 0, "tile_l must divide (padded) L"

    grid = (B, L_pad // tile_l)

    tile_total = _tile_vmem_bytes(tile_l, C, itemsize)
    # Explicit scoped-VMEM limit: comfortably covers the double-buffered padded
    # tiles, stays well below v7x's 64 MiB physical VMEM.
    vmem_limit = int(min(48 << 20, max(16 << 20, 4 * tile_total)))

    out = pl.pallas_call(
        _unembed_kernel,
        out_shape=jax.ShapeDtypeStruct((B, C, L_pad), x.dtype),
        grid_spec=pltpu.PrefetchScalarGridSpec(
            num_scalar_prefetch=0,
            grid=grid,
            in_specs=[
                # (None, tile_l, C): batch dim squeezed; kernel sees (tile_l, C).
                pl.BlockSpec((None, tile_l, C), lambda b, l: (b, l, 0)),
            ],
            # Lane-dense output block: last dim tile_l (multiple of 128).
            out_specs=pl.BlockSpec((None, C, tile_l), lambda b, l: (b, 0, l)),
        ),
        compiler_params=pltpu.CompilerParams(
            dimension_semantics=("parallel", "parallel"),
            vmem_limit_bytes=vmem_limit,
        ),
        cost_estimate=pl.CostEstimate(
            flops=0,
            transcendentals=0,
            bytes_accessed=2 * B * L_pad * C * itemsize,
        ),
    )(x_k)

    if L_pad != L:
        out = out[:, :, :L]

    # Free reshape of the trailing dim: (B, C, L) -> (B, C, H, W).
    return out.reshape(B, C, H, W)


if __name__ == "__main__":
    key = jax.random.PRNGKey(0)

    # Main test: shapes consistent with the module (x is (B, H*W, embed_dim)).
    B, C, H, W = 2, 32, 16, 16
    L = H * W
    x = jax.random.normal(key, (B, L, C), dtype=jnp.float32)

    out = patch_unembed_forward(x, (H, W))
    out = jax.block_until_ready(out)

    ref = jnp.transpose(x, (0, 2, 1)).reshape(B, C, H, W)
    assert out.shape == (B, C, H, W)
    assert bool(jnp.array_equal(out, ref))

    # Robustness check: ragged L (not a multiple of 128) and batch 1
    # (exercises the pad-to-512 path and the >=2-grid-step cap).
    B2, C2, H2, W2 = 1, 48, 10, 10
    L2 = H2 * W2
    x2 = jax.random.normal(jax.random.PRNGKey(0), (B2, L2, C2), dtype=jnp.float32)
    out2 = jax.block_until_ready(patch_unembed_forward(x2, (H2, W2)))
    ref2 = jnp.transpose(x2, (0, 2, 1)).reshape(B2, C2, H2, W2)
    assert out2.shape == (B2, C2, H2, W2)
    assert bool(jnp.array_equal(out2, ref2))

    print("KERNEL_OK")
</pallas_src>

<mosaic_0001>
module attributes {stable_mosaic.version = 11 : i64} {
  func.func @_unembed_kernel(%arg0: i32, %arg1: i32, %arg2: memref<1x256x32xf32, #tpu.memory_space<vmem>>, %arg3: memref<1x32x256xf32, #tpu.memory_space<vmem>>) attributes {dimension_semantics = [#tpu.dimension_semantics<parallel>, #tpu.dimension_semantics<parallel>], iteration_bounds = array<i64: 2, 1>, scalar_prefetch = 0 : i64, scratch_operands = 0 : i64, tpu.core_type = #tpu.core_type<tc>, window_params = [{transform_indices = @transform_0, window_bounds = array<i64: 1, 256, 32>}, {transform_indices = @transform_1, window_bounds = array<i64: 1, 32, 256>}]} {
    %c0 = arith.constant 0 : index
    %c0_0 = arith.constant 0 : index
    %c0_1 = arith.constant 0 : index
    %0 = vector.load %arg2[%c0, %c0_0, %c0_1] : memref<1x256x32xf32, #tpu.memory_space<vmem>>, vector<1x256x32xf32>
    %1 = vector.shape_cast %0 : vector<1x256x32xf32> to vector<256x32xf32>
    %2 = tpu.transpose %1, [1, 0] : vector<256x32xf32> -> vector<32x256xf32>
    %c0_2 = arith.constant 0 : index
    %c0_3 = arith.constant 0 : index
    %c0_4 = arith.constant 0 : index
    %3 = vector.load %arg3[%c0_2, %c0_3, %c0_4] : memref<1x32x256xf32, #tpu.memory_space<vmem>>, vector<1x32x256xf32>
    %4 = vector.shape_cast %3 : vector<1x32x256xf32> to vector<32x256xf32>
    %5 = vector.shape_cast %2 : vector<32x256xf32> to vector<1x32x256xf32>
    tpu.vector_store %arg3[%c0_2, %c0_3, %c0_4], %5 {strides = array<i32>} : memref<1x32x256xf32, #tpu.memory_space<vmem>>, vector<1x32x256xf32>,
    return
  }
  func.func @transform_0(%arg0: i32, %arg1: i32) -> (i32, i32, i32) {
    %c0_i32 = arith.constant 0 : i32
    %c0_i32_0 = arith.constant 0 : i32
    return %arg0, %arg1, %c0_i32 : i32, i32, i32
  }
  func.func @transform_1(%arg0: i32, %arg1: i32) -> (i32, i32, i32) {
    %c0_i32 = arith.constant 0 : i32
    %c0_i32_0 = arith.constant 0 : i32
    return %arg0, %c0_i32, %arg1 : i32, i32, i32
  }
}

</mosaic_0001>

<bundles_post_ra>
// kernel: tpu_custom_call.1
= control target key start
LH: loop header
LB: loop body
LE: loop exit
PB: predicated region body
PF: predicated region fallthrough
CT: control target
= control target key end

     0   :  { %6 = vsyncpa [#allocation3], 0  ;;  %s642_s0 = inlined_call_operand.vmem [shape: f32[2,256,32], index: 0, kind: input, shape index: {}]   ;;  %s643_s1 = inlined_call_operand.hbm [shape: f32[2,32,256], index: 1, kind: output, shape index: {}]  }
   0x1   :  { %8 = vsyncpa [#allocation3 + $0x1], 0  ;;  %s511_s6 = smov 0   ;;  %s513_s7 = smov 0  }
   0x2   :  { %s515_s8 = smov 0   ;;  %s517_s9 = smov 0  }
   0x3   :  { %s519_s10 = smov 0   ;;  %s521_s11 = smov 0  }
   0x4 LB: > { %s347_s12 = sadd.s32 4294967295, %s497_s11   ;;  %s348_s13 = sadd.s32 4294967294, %s497_s11   ;;  %s497_s11 = sphi %s521_s11, %s14_s11   ;;  %s493_s10 = sphi %s519_s10, %s650_s10   ;;  %s489_s9 = sphi %s517_s9, %s649_s9   ;;  %s485_s8 = sphi %s515_s8, %s648_s8   ;;  %s481_s7 = sphi %s513_s7, %s647_s7   ;;  %s477_s6 = sphi %s511_s6, %s646_s6  }
   0x5   : > { %s26_s14 = sadd.s32 1, %s493_s10  ;;  %s63_s15 = sadd.s32 1, %s485_s8 }
   0x6   : > { %p28_p0 = scmp.ge.s32.totalorder %s26_s14, 2  ;;  %p73_p1 = scmp.ne.s32.totalorder %s485_s8, %s481_s7 }
   0x7   : > { %p74_p2 = scmp.eq.s32.totalorder %s347_s12, 1  ;;  %p79_p3 = scmp.ne.s32.totalorder %s481_s7, %s477_s6 }
   0x8   : > { %s652_s14 = smov (%p28_p0, %s26_s14), 0  ;;  %p80_p5 = scmp.eq.s32.totalorder %s348_s13, 1 }
   0x9   : > { %p551_p4 = por %p74_p2, %p73_p1  ;;  %s58_s17 = ssub.s32 %s493_s10, %s652_s14 }
   0xa   : > { %p351_p6 = scmp.ge.s32.totalorder %s497_s11, 1  ;;  %p61_p7 = scmp.eq.s32.totalorder %s58_s17, 0 }
   0xb   : > { %p558_p8 = por %p80_p5, %p79_p3  ;;  %p111_p9 = scmp.lt.s32.totalorder %s497_s11, 3 }
   0xc   : > { %s564_s19 = scalar_select %p61_p7, %s485_s8, %s63_s15  }
   0xd   : > { %p112_p10 = pnand %p351_p6, %p111_p9 }
   0xe   : > { %p136_p11 = scmp.lt.s32.totalorder (!%p112_p10), %s489_s9, 1  ;;  %s132_s25 = sand.u32 (!%p112_p10), 1, %s481_s7  }
   0xf   : > { %115 = sbr.rel (%p112_p10) target bundleno = 219 (0xdb), region = 24  ;;  %s352_s26 = sshll.u32 (!%p112_p10), %s132_s25, 6 }
  0x10   : > { %s134_s27 = scalar_lea.vmem (!%p112_p10), [#allocation2], %s352_s26  ;;  %s361_s28 = sshll.u32 (!%p112_p10), %s489_s9, 6 }
  0x11   : > { %s264_s2 = scalar_lea.hbm (!%p112_p10), %s643_s1, %s361_s28  ;;  %s265_s3 = sshll.u32 (!%p112_p10), %s134_s27, 4  ;;  %s266_s3 = int_to_ptr.vmem [resolvable:$true] %s265_s3 }
  0x12   : > { %s267_s4 = sshll.u32 (!%p112_p10), %s264_s2, 4  ;;  %s251_s5 = scalar_lea.sflag (!%p112_p10), [#allocation3], %s132_s25  ;;  %s268_s4 = int_to_ptr.hbm [resolvable:$true] %s267_s4 }
  0x13   : > { %s433_s12 = sshra.s32 (!%p112_p10), %s268_s4, 4  ;;  %s439_s17 = scalar_lea.hbm (!%p112_p10), %s643_s1, 128  ;;  %s434_s12 = int_to_ptr.hbm [resolvable:$true] %s433_s12 }
  0x14   : > { %s137_s20 = scalar_select %p136_p11, %s489_s9, 1 }
  0x15   : > { %s435_s9 = scalar_lea.hbm %s434_s12, 64  ;;  %p440_p1 = scmp.lt.s32.totalorder %s434_s12, %s643_s1 }
  0x16   : > { %s360_s21 = sshll.u32 %s137_s20, 8  ;;  %p436_p12 = scmp.ne.s32.totalorder %s434_s12, %s435_s9 }
  0x17   : > { %s571_s24 = scalar_lea.vmem %s642_s0, %s360_s21  ;;  %p441_p2 = scmp.lt.s32.totalorder %s439_s17, %s435_s9 }
  0x18   : > { %v162_v0 = vld [vmem:[%s571_s24 + $0x80] sm:$0xff]  ;;  %v163_v2 = vld [vmem:[%s571_s24 + $0x88] sm:$0xff]  ;;  %v164_v4 = vld [vmem:[%s571_s24 + $0x90] sm:$0xff]  ;;  %p437_p13 = pnand %p436_p12, %p551_p4 }
  0x19   : > { %v146_v1 = vld [vmem:[%s571_s24] sm:$0xff]  ;;  %210 = vxpose.xlu1.b32.start [1/16] (narrow) %v162_v0, 32  ;;  %v147_v3 = vld [vmem:[%s571_s24 + $0x8] sm:$0xff]  ;;  %v148_v5 = vld [vmem:[%s571_s24 + $0x10] sm:$0xff]  ;;  %p442_p3 = por %p441_p2, %p440_p1 }
  0x1a   : > { %178 = vxpose.xlu0.b32.start [1/16] (narrow) %v146_v1, 32  ;;  %v165_v6 = vld [vmem:[%s571_s24 + $0x98] sm:$0xff]  ;;  %v166_v8 = vld [vmem:[%s571_s24 + $0xa0] sm:$0xff]  ;;  %v167_v10 = vld [vmem:[%s571_s24 + $0xa8] sm:$0xff]  ;;  %p438_p0 = pneg %p437_p13 }
  0x1b   : > { %v149_v7 = vld [vmem:[%s571_s24 + $0x18] sm:$0xff]  ;;  %v150_v9 = vld [vmem:[%s571_s24 + $0x20] sm:$0xff]  ;;  %v151_v11 = vld [vmem:[%s571_s24 + $0x28] sm:$0xff] }
  0x1c   : > { %v168_v12 = vld [vmem:[%s571_s24 + $0xb0] sm:$0xff]  ;;  %v169_v14 = vld [vmem:[%s571_s24 + $0xb8] sm:$0xff]  ;;  %v170_v16 = vld [vmem:[%s571_s24 + $0xc0] sm:$0xff]  ;;  %p443_p5 = pnand %p442_p3, %p438_p0 }
  0x1d   : > { %v152_v13 = vld [vmem:[%s571_s24 + $0x30] sm:$0xff]  ;;  %v153_v15 = vld [vmem:[%s571_s24 + $0x38] sm:$0xff]  ;;  %v154_v17 = vld [vmem:[%s571_s24 + $0x40] sm:$0xff] }
  0x1e   : > { %v171_v18 = vld [vmem:[%s571_s24 + $0xc8] sm:$0xff]  ;;  %v172_v20 = vld [vmem:[%s571_s24 + $0xd0] sm:$0xff]  ;;  %v173_v22 = vld [vmem:[%s571_s24 + $0xd8] sm:$0xff] }
  0x1f   : > { %v155_v19 = vld [vmem:[%s571_s24 + $0x48] sm:$0xff]  ;;  %v156_v21 = vld [vmem:[%s571_s24 + $0x50] sm:$0xff]  ;;  %v157_v23 = vld [vmem:[%s571_s24 + $0x58] sm:$0xff] }
  0x20   : > { %v174_v24 = vld [vmem:[%s571_s24 + $0xe0] sm:$0xff]  ;;  %v175_v26 = vld [vmem:[%s571_s24 + $0xe8] sm:$0xff]  ;;  %v176_v28 = vld [vmem:[%s571_s24 + $0xf0] sm:$0xff] }
  0x21   : > { %211 = vxpose.xlu1.b32.cont [2/16] (narrow) %v163_v2, 32  ;;  %v158_v25 = vld [vmem:[%s571_s24 + $0x60] sm:$0xff]  ;;  %v159_v27 = vld [vmem:[%s571_s24 + $0x68] sm:$0xff]  ;;  %v160_v29 = vld [vmem:[%s571_s24 + $0x70] sm:$0xff] }
  0x22   : > { %179 = vxpose.xlu0.b32.cont [2/16] (narrow) %v147_v3, 32  ;;  %v177_v30 = vld [vmem:[%s571_s24 + $0xf8] sm:$0xff] }
  0x23   : > { %v161_v31 = vld [vmem:[%s571_s24 + $0x78] sm:$0xff] }
  0x29   : > { %212 = vxpose.xlu1.b32.cont [3/16] (narrow) %v164_v4, 32 }
  0x2a   : > { %180 = vxpose.xlu0.b32.cont [3/16] (narrow) %v148_v5, 32 }
  0x31   : > { %213 = vxpose.xlu1.b32.cont [4/16] (narrow) %v165_v6, 32 }
  0x32   : > { %181 = vxpose.xlu0.b32.cont [4/16] (narrow) %v149_v7, 32 }
  0x39   : > { %214 = vxpose.xlu1.b32.cont [5/16] (narrow) %v166_v8, 32 }
  0x3a   : > { %182 = vxpose.xlu0.b32.cont [5/16] (narrow) %v150_v9, 32 }
  0x41   : > { %215 = vxpose.xlu1.b32.cont [6/16] (narrow) %v167_v10, 32 }
  0x42   : > { %183 = vxpose.xlu0.b32.cont [6/16] (narrow) %v151_v11, 32 }
  0x49   : > { %216 = vxpose.xlu1.b32.cont [7/16] (narrow) %v168_v12, 32 }
  0x4a   : > { %184 = vxpose.xlu0.b32.cont [7/16] (narrow) %v152_v13, 32 }
  0x51   : > { %217 = vxpose.xlu1.b32.cont [8/16] (narrow) %v169_v14, 32 }
  0x52   : > { %185 = vxpose.xlu0.b32.cont [8/16] (narrow) %v153_v15, 32 }
  0x59   : > { %218 = vxpose.xlu1.b32.cont [9/16] (narrow) %v170_v16, 32 }
  0x5a   : > { %186 = vxpose.xlu0.b32.cont [9/16] (narrow) %v154_v17, 32 }
  0x61   : > { %219 = vxpose.xlu1.b32.cont [10/16] (narrow) %v171_v18, 32 }
  0x62   : > { %187 = vxpose.xlu0.b32.cont [10/16] (narrow) %v155_v19, 32 }
  0x69   : > { %220 = vxpose.xlu1.b32.cont [11/16] (narrow) %v172_v20, 32 }
  0x6a   : > { %188 = vxpose.xlu0.b32.cont [11/16] (narrow) %v156_v21, 32 }
  0x71   : > { %221 = vxpose.xlu1.b32.cont [12/16] (narrow) %v173_v22, 32 }
  0x72   : > { %189 = vxpose.xlu0.b32.cont [12/16] (narrow) %v157_v23, 32 }
  0x79   : > { %222 = vxpose.xlu1.b32.cont [13/16] (narrow) %v174_v24, 32 }
  0x7a   : > { %190 = vxpose.xlu0.b32.cont [13/16] (narrow) %v158_v25, 32 }
  0x81   : > { %223 = vxpose.xlu1.b32.cont [14/16] (narrow) %v175_v26, 32 }
  0x82   : > { %191 = vxpose.xlu0.b32.cont [14/16] (narrow) %v159_v27, 32 }
  0x89   : > { %224 = vxpose.xlu1.b32.cont [15/16] (narrow) %v176_v28, 32 }
  0x8a   : > { %192 = vxpose.xlu0.b32.cont [15/16] (narrow) %v160_v29, 32 }
  0x91   : > { %225 = vxpose.xlu1.b32.end [16/16] (narrow) %v177_v30, 32 }
  0x92   : > { %193 = vxpose.xlu0.b32.end [16/16] (narrow) %v161_v31, 32 }
  0xbd   : > { %v226_v32 = vpop.trf.xlu1 }
  0xbe   : > { %v194_v33 = vpop.trf.xlu0  ;;  %243 = vst [vmem:[%s134_s27 + $0x8] sm:$0xff] %v226_v32 }
  0xbf   : > { %242 = vst [vmem:[%s134_s27] sm:$0xff] %v194_v33 }
  0xc5   : > { %v227_v34 = vpop.trf.xlu1 }
  0xc6   : > { %v195_v35 = vpop.trf.xlu0  ;;  %245 = vst [vmem:[%s134_s27 + $0x18] sm:$0xff] %v227_v34 }
  0xc7   : > { %244 = vst [vmem:[%s134_s27 + $0x10] sm:$0xff] %v195_v35 }
  0xcd   : > { %v228_v36 = vpop.trf.xlu1 }
  0xce   : > { %v196_v37 = vpop.trf.xlu0  ;;  %247 = vst [vmem:[%s134_s27 + $0x28] sm:$0xff] %v228_v36 }
  0xcf   : > { %246 = vst [vmem:[%s134_s27 + $0x20] sm:$0xff] %v196_v37 }
  0xd5   : > { %v229_v38 = vpop.trf.xlu1 }
  0xd6   : > { %v197_v39 = vpop.trf.xlu0  ;;  %249 = vst [vmem:[%s134_s27 + $0x38] sm:$0xff] %v229_v38 }
  0xd7   : > { %248 = vst [vmem:[%s134_s27 + $0x30] sm:$0xff] %v197_v39 }
  0xd8   : > { %446 = shalt.err (!%p443_p5)
}
  0xd9   : > { %s499_s22 = smov 256   ;;  %s500_s23 = smov 16  }
  0xda   : > { %362 = dma.vmem_to_hbm [thread:$0]  (%p551_p4), %s266_s3, 1024, %s268_s4, %s251_s5, %s499_s22, %s499_s22, %s500_s23  }
  0xdb PF: > { %p368_p6 = scmp.ge.s32.totalorder %s497_s11, 2  ;;  %s282_s24 = sand.u32 1, %s477_s6  }
  0xdc   : > { %s283_s25 = scalar_lea.sflag [#allocation3], %s282_s24 }
  0xdd   : > { %p365_p7 = pnand %p368_p6, %p558_p8 }
  0xdf   : > { %p366_p9 = pneg %p365_p7 }
  0xe1   : > { %472 = dma.done.wait (%p366_p9), %s283_s25, 1024  }
  0xe2   : > { %474 = vsyncadd (%p366_p9), %s283_s25, 4294966272  ;;  %s14_s11 = sadd.s32 1, %s497_s11   ;;  %s646_s6 = smov %s481_s7 }
  0xe3   : > { %p11_p10 = scmp.ge.s32.totalorder %s14_s11, 4   ;;  %s647_s7 = smov %s485_s8 }
  0xe4   : > { %s648_s8 = smov %s564_s19  ;;  %s649_s9 = smov %s493_s10 }
  0xe5   : > { %s650_s10 = smov %s652_s14  ;;  %13 = sbr.rel (!%p11_p10) target bundleno = 4 (0x4), region = 59 }
  0xea   :  { %289 = vsyncpa [#allocation3], 1 }
  0xeb   :  { %291 = vsyncpa [#allocation3 + $0x1], 1 }

</bundles_post_ra>
